<compile_context>
chip_gen: v7x
topology: tpu7x:2x2x1
jax: 0.10.0
libtpu: 0.0.40
codegen_flags: <defaults>
</compile_context>

<pallas_src>
import jax
import jax.numpy as jnp
from jax.experimental import pallas as pl
from jax.experimental.pallas import tpu as pltpu


def _round_up(n, m):
    return ((n + m - 1) // m) * m


def _affine_kernel(x_ref, wc_ref, bc_ref, o_ref):
    # Single collapsed affine: one MXU push per batch tile, bias add on the VPU.
    o_ref[...] = (
        jnp.dot(x_ref[...], wc_ref[...], preferred_element_type=jnp.float32)
        + bc_ref[...]
    ).astype(o_ref.dtype)


def collapse_params(params):
    """Fold the 4 activation-free Linear layers into one (16->26) affine."""
    w1, w2, w3, w4 = (params[f"w{i}"] for i in range(1, 5))
    b1, b2, b3, b4 = (params[f"b{i}"] for i in range(1, 5))
    wc = w1 @ w2 @ w3 @ w4                                   # (16, 26)
    bc = ((b1 @ w2 + b2) @ w3 + b3) @ w4 + b4                # (1, 26)
    return wc.astype(jnp.float32), bc.astype(jnp.float32)


def net_emb_forward(x, params, *, block_b=1024, force_pallas=False):
    """x: (B, 16) float32.  params: dict of w1..w4 (in,out), b1..b4 (1,out)."""
    B, in_dim = x.shape
    wc, bc = collapse_params(params)
    out_dim = wc.shape[1]

    # Tiny batches: let XLA fuse the single affine; the kernel launch dominates.
    if B < 64 and not force_pallas:
        return x @ wc + bc

    # Batch tile: multiple of 8 (sublane), capped at block_b, padded batch.
    TB = min(block_b, _round_up(B, 8))
    Bp = _round_up(B, TB)
    xp = x if Bp == B else jnp.pad(x, ((0, Bp - B), (0, 0)))

    grid = (Bp // TB,)

    cost = pl.CostEstimate(
        flops=2 * Bp * in_dim * out_dim,
        transcendentals=0,
        bytes_accessed=Bp * (in_dim + out_dim) * 4 + (in_dim * out_dim + out_dim) * 4,
    )

    out = pl.pallas_call(
        _affine_kernel,
        out_shape=jax.ShapeDtypeStruct((Bp, out_dim), jnp.float32),
        grid=grid,
        in_specs=[
            pl.BlockSpec((TB, in_dim), lambda i: (i, 0)),      # x: tiled over batch
            pl.BlockSpec((in_dim, out_dim), lambda i: (0, 0)),  # Wc: VMEM-resident
            pl.BlockSpec((1, out_dim), lambda i: (0, 0)),       # bc: VMEM-resident
        ],
        out_specs=pl.BlockSpec((TB, out_dim), lambda i: (i, 0)),
        compiler_params=pltpu.CompilerParams(
            dimension_semantics=("parallel",),   # batch tiles split across TCs (v7x)
        ),
        cost_estimate=cost,
    )(xp, wc, bc)

    return out if Bp == B else out[:B]


def init_params(key):
    """Deterministic synthetic init matching nn.Linear shapes.
    PyTorch stores W as (out, in); we store the transpose (in, out)."""
    dims = [(16, 32), (32, 64), (64, 32), (32, 26)]
    params = {}
    for i, (fin, fout) in enumerate(dims, start=1):
        key, kw, kb = jax.random.split(key, 3)
        bound = 1.0 / jnp.sqrt(fin)  # same scale as PyTorch's default uniform init
        params[f"w{i}"] = jax.random.uniform(
            kw, (fin, fout), jnp.float32, minval=-bound, maxval=bound)
        params[f"b{i}"] = jax.random.uniform(
            kb, (1, fout), jnp.float32, minval=-bound, maxval=bound)
    return params


def net_emb_reference(x, params):
    """Pure-JAX reference of the original 4-layer forward (no activations)."""
    h = x
    for i in range(1, 5):
        h = h @ params[f"w{i}"] + params[f"b{i}"]
    return h


if __name__ == "__main__":
    key = jax.random.PRNGKey(0)
    kx, kx2, kp = jax.random.split(key, 3)
    params = init_params(kp)

    # Small-batch path (forces the Pallas kernel so it is actually exercised).
    B_small = 8
    x_small = jax.random.normal(kx, (B_small, 16), jnp.float32)
    out_small = jax.block_until_ready(
        net_emb_forward(x_small, params, force_pallas=True))
    ref_small = net_emb_reference(x_small, params)
    assert out_small.shape == (B_small, 26)
    assert jnp.allclose(out_small, ref_small, atol=1e-3, rtol=1e-3)

    # Larger, non-multiple-of-tile batch: exercises the tiled grid + padding path.
    B_big = 2000
    x_big = jax.random.normal(kx2, (B_big, 16), jnp.float32)
    out_big = jax.block_until_ready(
        net_emb_forward(x_big, params, block_b=1024))
    ref_big = net_emb_reference(x_big, params)
    assert out_big.shape == (B_big, 26)
    assert jnp.allclose(out_big, ref_big, atol=1e-3, rtol=1e-3)

    print("KERNEL_OK")
</pallas_src>

<mosaic_0001>
module attributes {stable_mosaic.version = 11 : i64} {
  func.func @_affine_kernel(%arg0: i32, %arg1: memref<8x16xf32, #tpu.memory_space<vmem>>, %arg2: memref<16x26xf32, #tpu.memory_space<vmem>>, %arg3: memref<1x26xf32, #tpu.memory_space<vmem>>, %arg4: memref<8x26xf32, #tpu.memory_space<vmem>>) attributes {dimension_semantics = [#tpu.dimension_semantics<parallel>], iteration_bounds = array<i64: 1>, scalar_prefetch = 0 : i64, scratch_operands = 0 : i64, tpu.core_type = #tpu.core_type<tc>, window_params = [{transform_indices = @transform_0, window_bounds = array<i64: 8, 16>}, {pipeline_mode = #tpu.pipeline_mode<synchronous>, transform_indices = @transform_1, window_bounds = array<i64: 16, 26>}, {pipeline_mode = #tpu.pipeline_mode<synchronous>, transform_indices = @transform_2, window_bounds = array<i64: 1, 26>}, {transform_indices = @transform_3, window_bounds = array<i64: 8, 26>}]} {
    %c0 = arith.constant 0 : index
    %c0_0 = arith.constant 0 : index
    %0 = vector.load %arg1[%c0, %c0_0] : memref<8x16xf32, #tpu.memory_space<vmem>>, vector<8x16xf32>
    %c0_1 = arith.constant 0 : index
    %c0_2 = arith.constant 0 : index
    %1 = vector.load %arg2[%c0_1, %c0_2] : memref<16x26xf32, #tpu.memory_space<vmem>>, vector<16x26xf32>
    %cst = arith.constant dense<0.000000e+00> : vector<8x26xf32>
    %2 = tpu.matmul %0, %1, %cst {dimension_numbers = #tpu.dot_dimension_numbers<[1], [0], [0], [1], [0, 0, 1, 1], [], []>} : vector<8x16xf32>, vector<16x26xf32>, vector<8x26xf32> -> vector<8x26xf32>
    %c0_3 = arith.constant 0 : index
    %c0_4 = arith.constant 0 : index
    %3 = vector.load %arg3[%c0_3, %c0_4] : memref<1x26xf32, #tpu.memory_space<vmem>>, vector<1x26xf32>
    %4 = vector.broadcast %3 : vector<1x26xf32> to vector<8x26xf32>
    %5 = arith.addf %2, %4 : vector<8x26xf32>
    %c0_5 = arith.constant 0 : index
    %c0_6 = arith.constant 0 : index
    %6 = vector.load %arg4[%c0_5, %c0_6] : memref<8x26xf32, #tpu.memory_space<vmem>>, vector<8x26xf32>
    tpu.vector_store %arg4[%c0_5, %c0_6], %5 {strides = array<i32>} : memref<8x26xf32, #tpu.memory_space<vmem>>, vector<8x26xf32>,
    return
  }
  func.func @transform_0(%arg0: i32) -> (i32, i32) {
    %c0_i32 = arith.constant 0 : i32
    %c0_i32_0 = arith.constant 0 : i32
    return %arg0, %c0_i32 : i32, i32
  }
  func.func @transform_1(%arg0: i32) -> (i32, i32) {
    %c0_i32 = arith.constant 0 : i32
    %c0_i32_0 = arith.constant 0 : i32
    %c0_i32_1 = arith.constant 0 : i32
    return %c0_i32, %c0_i32_0 : i32, i32
  }
  func.func @transform_2(%arg0: i32) -> (i32, i32) {
    %c0_i32 = arith.constant 0 : i32
    %c0_i32_0 = arith.constant 0 : i32
    %c0_i32_1 = arith.constant 0 : i32
    return %c0_i32, %c0_i32_0 : i32, i32
  }
  func.func @transform_3(%arg0: i32) -> (i32, i32) {
    %c0_i32 = arith.constant 0 : i32
    %c0_i32_0 = arith.constant 0 : i32
    return %arg0, %c0_i32 : i32, i32
  }
}

</mosaic_0001>

<bundles_post_ra>
// kernel: tpu_custom_call.1
= control target key start
LH: loop header
LB: loop body
LE: loop exit
PB: predicated region body
PF: predicated region fallthrough
CT: control target
= control target key end

     0   :  { %8 = vsyncpa [#allocation3], 0  ;;  %s312_s0 = inlined_call_operand.hbm [shape: f32[8,16], index: 0, kind: input, shape index: {}]   ;;  %s313_s1 = inlined_call_operand.hbm [shape: f32[16,26], index: 1, kind: input, shape index: {}]   ;;  %s314_s2 = inlined_call_operand.vmem [shape: f32[1,26], index: 2, kind: input, shape index: {}]   ;;  %s315_s3 = inlined_call_operand.hbm [shape: f32[8,26], index: 3, kind: output, shape index: {}]  }
   0x1   :  { %9 = vsyncpa [#allocation6], 0 }
   0x2   :  { %10 = vsyncpa [#allocation4], 0  ;;  %s238_s12 = smov [#allocation2]   ;;  %s239_s14 = smov [#allocation5]  }
   0x3   :  { %s17_s13 = sshll.u32 %s238_s12, 4  ;;  %s26_s15 = sshll.u32 %s239_s14, 4  ;;  %s18_s13 = int_to_ptr.vmem [resolvable:$true] %s17_s13  ;;  %s266_s15 = int_to_ptr.vmem [resolvable:$true] %s26_s15 }
   0x4   :  { %s166_s18 = scalar_lea.hbm %s312_s0, 128 }
   0x5   :  { %p167_p0 = scmp.ne.s32.totalorder %s312_s0, %s166_s18  ;;  %p170_p1 = scmp.lt.u32.totalorder %s166_s18, %s312_s0 }
   0x7   :  { %p172_p2 = pnand %p170_p1, %p167_p0 }
   0x9   :  { %175 = shalt.err (!%p172_p2)
}
   0xa   :  { %s176_s23 = scalar_lea.vmem %s18_s13, 128  ;;  %p181_p4 = scmp.lt.s32.totalorder %s18_s13, %s18_s13 }
   0xb   :  { %p177_p3 = scmp.ne.s32.totalorder %s18_s13, %s176_s23  ;;  %p182_p5 = scmp.lt.s32.totalorder %s176_s23, %s176_s23 }
   0xd   :  { %p183_p6 = por %p182_p5, %p181_p4 }
   0xf   :  { %p184_p7 = pnand %p183_p6, %p177_p3 }
  0x11   :  { %187 = shalt.err (!%p184_p7)
}
  0x12   :  { %20 = dma.hbm_to_vmem [thread:$0]  %s312_s0, 128, %s18_s13, [#allocation3]  }
  0x13   :  { %s188_s28 = scalar_lea.hbm %s313_s1, 256 }
  0x14   :  { %p189_p8 = scmp.ne.s32.totalorder %s313_s1, %s188_s28  ;;  %p192_p9 = scmp.lt.u32.totalorder %s188_s28, %s313_s1 }
  0x16   :  { %p194_p10 = pnand %p192_p9, %p189_p8 }
  0x18   :  { %197 = shalt.err (!%p194_p10)
}
  0x19   :  { %s198_s6 = scalar_lea.vmem %s266_s15, 256  ;;  %p203_p12 = scmp.lt.s32.totalorder %s266_s15, %s266_s15 }
  0x1a   :  { %p199_p11 = scmp.ne.s32.totalorder %s266_s15, %s198_s6  ;;  %p204_p13 = scmp.lt.s32.totalorder %s198_s6, %s198_s6 }
  0x1c   :  { %p205_p0 = por %p204_p13, %p203_p12 }
  0x1e   :  { %p206_p1 = pnand %p205_p0, %p199_p11 }
  0x20   :  { %209 = shalt.err (!%p206_p1)
}
  0x21   :  { %s240_s0 = smov 128   ;;  %s241_s7 = smov 8  }
  0x22   :  { %32 = dma.hbm_to_vmem [thread:$0]  %s313_s1, 256, %s266_s15, [#allocation6], %s240_s0, %s240_s0, %s241_s7  }
  0x23   :  { %232 = dma.done.wait [#allocation3], 128  }
  0x24   :  { %233 = vsyncadd [#allocation3], 4294967168 }
  0x25   :  { %234 = dma.done.wait [#allocation6], 256  }
  0x26   :  { %235 = vsyncadd [#allocation6], 4294967040  ;;  %v242_v0 = vmov 0.0|0.0   ;;  %vm243_vm0 = vmmov 0   ;;  %v244_v1 = vmov 0.0   ;;  %v42_v2 = vld [vmem:[#allocation5] sm:$0xff] }
  0x27   :  { %155 = vmatprep.subr.bf16.mxu0 %v242_v0  ;;  %152 = vmatprep.mubr.msk.f32.mxu0 %vm243_vm0, %v244_v1  ;;  %v43_v3 = vld [vmem:[#allocation5 + $0x8] sm:$0xff]  ;;  %v41_v5 = vld [vmem:[#allocation2] sm:$0xff]  ;;  %vm51_vm1 = vcmask 130048   ;;  %s245_s1 = smov [#allocation7]   ;;  %vm125_vm2 = vcmask 211968  }
  0x28   :  { %v156_v4 = vpack.c.bf16 %v43_v3, %v42_v2  ;;  %v143_v6 = vld [vmem:[%s314_s2] ss:$0 sm:$0xff]  ;;  %s133_s12 = sshll.u32 %s245_s1, 4  ;;  %s134_s12 = int_to_ptr.vmem [resolvable:$true] %s133_s12 }
  0x29   :  { %s210_s13 = scalar_lea.vmem %s134_s12, 128  ;;  %p215_p3 = scmp.lt.s32.totalorder %s134_s12, %s134_s12 }
  0x2a   :  { %157 = vmatpush3.bf16.msra.mxu0 %v156_v4  ;;  %p211_p2 = scmp.ne.s32.totalorder %s134_s12, %s210_s13  ;;  %p216_p4 = scmp.lt.s32.totalorder %s210_s13, %s210_s13 }
  0x2c   :  { %p217_p5 = por %p216_p4, %p215_p3 }
  0x2d   :  { %153 = vmatmul.mubr.msk.f32.vlgmr.msra.gmra.mrb[0].mxu0 %vm51_vm1, %v41_v5 }
  0x2e   :  { %p218_p6 = pnand %p217_p5, %p211_p2 }
 0x100   :  { %v121_v7 = vpop.f32.mrb[0].mxu0 }
 0x101   :  { %v122_v8 = vadd.f32 %v143_v6, %v121_v7  ;;  %v154_v9 = vpop.f32.mrb[1].mxu0 }
 0x103   :  { %126 = vst.msk [vmem:[#allocation7] sm:$0xff] %vm125_vm2, %v122_v8 }
 0x104   :  { %221 = shalt.err (!%p218_p6)
}
 0x105   :  { %s222_s16 = scalar_lea.hbm %s315_s3, 128 }
 0x106   :  { %p223_p7 = scmp.ne.s32.totalorder %s315_s3, %s222_s16  ;;  %p226_p8 = scmp.lt.u32.totalorder %s222_s16, %s315_s3 }
 0x108   :  { %p228_p9 = pnand %p226_p8, %p223_p7 }
 0x10a   :  { %231 = shalt.err (!%p228_p9)
}
 0x10b   :  { %136 = dma.vmem_to_hbm [thread:$0]  %s134_s12, 128, %s315_s3, [#allocation4]  }
 0x10c   :  { %236 = dma.done.wait [#allocation4], 128  }
 0x10d   :  { %237 = vsyncadd [#allocation4], 4294967168 }
 0x10e   :  { %140 = vsyncpa [#allocation3], 1 }
 0x10f   :  { %141 = vsyncpa [#allocation6], 1 }
 0x110   :  { %142 = vsyncpa [#allocation4], 1 }

</bundles_post_ra>
